<compile_context>
chip_gen: v7x
topology: tpu7x:2x2x1
jax: 0.10.0
libtpu: 0.0.40
codegen_flags: <defaults>
</compile_context>

<pallas_src>
import functools

import jax
import jax.numpy as jnp
from jax.experimental import pallas as pl
from jax.experimental.pallas import tpu as pltpu


# ----------------------------------------------------------------------------
# Fused Pallas kernel: graph encoder + graph_proj + classifier + text_proj
# ----------------------------------------------------------------------------
def _fused_kernel(xf_ref, pooled_ref, wbig_ref, bg_ref, wcomb_ref, bcomb_ref,
                  wt_ref, tb_ref, gemb_ref, temb_ref, logit_ref):
    """One batch tile of the whole TabGLM forward.

      xf_ref    : (bt, N*F)     bf16  flattened node features per sample
      pooled_ref: (bt, D)       bf16  mean-pooled text token embeddings
      wbig_ref  : (N*F, N*E)    bf16  folded (A, Wg) GCN block weight
      bg_ref    : (1, N*E)      f32   GCN bias tiled over nodes
      wcomb_ref : (N*E, D+CP)   bf16  folded [pool∘proj | pool∘proj∘classifier]
      bcomb_ref : (1, D+CP)     f32   corresponding biases
      wt_ref    : (D, D)        bf16  text_projection weight
      tb_ref    : (1, D)        f32   text_projection bias
      gemb_ref  : (bt, D)       f32   graph embeddings
      temb_ref  : (bt, D)       f32   text embeddings
      logit_ref : (bt, CP)      f32   logits, lane-padded (sliced outside)
    """
    d = gemb_ref.shape[1]

    # Graph encoder: ReLU(A @ X @ Wg + bg), with A and Wg pre-folded into one
    # dense weight so this is a single lane-dense MXU matmul.
    h = jnp.dot(xf_ref[...], wbig_ref[...], preferred_element_type=jnp.float32)
    h = jnp.maximum(h + bg_ref[...], 0.0)                      # (bt, N*E) f32

    # pooling + graph_projection + classifier folded into ONE 256-lane matmul.
    gl = jnp.dot(h.astype(jnp.bfloat16), wcomb_ref[...],
                 preferred_element_type=jnp.float32) + bcomb_ref[...]
    gemb_ref[...] = gl[:, :d]
    logit_ref[...] = gl[:, d:]

    # Text projection on the (already pooled) text embeddings.
    temb_ref[...] = jnp.dot(pooled_ref[...], wt_ref[...],
                            preferred_element_type=jnp.float32) + tb_ref[...]


def _batch_tiling(b):
    """Pick (bt, padded_B): big tiles to amortize per-step overhead, multiple
    of 8 when tiled, and >=2 grid steps when the batch allows (megacore)."""
    if b < 16:
        return b, b                       # single step; block == full batch dim
    bt = min(256, max(8, (b // 2) // 8 * 8))
    bp = ((b + bt - 1) // bt) * bt
    return bt, bp


def _fused_forward_call(x_flat, pooled, folded, bt):
    bp, nf = x_flat.shape
    d = folded["text_w"].shape[0]
    ne, dcp = folded["w_comb"].shape
    cp = dcp - d
    return pl.pallas_call(
        _fused_kernel,
        out_shape=(jax.ShapeDtypeStruct((bp, d), jnp.float32),
                   jax.ShapeDtypeStruct((bp, d), jnp.float32),
                   jax.ShapeDtypeStruct((bp, cp), jnp.float32)),
        grid=(bp // bt,),
        in_specs=[
            pl.BlockSpec((bt, nf), lambda b: (b, 0)),
            pl.BlockSpec((bt, d), lambda b: (b, 0)),
            pl.BlockSpec((nf, ne), lambda b: (0, 0)),
            pl.BlockSpec((1, ne), lambda b: (0, 0)),
            pl.BlockSpec((ne, dcp), lambda b: (0, 0)),
            pl.BlockSpec((1, dcp), lambda b: (0, 0)),
            pl.BlockSpec((d, d), lambda b: (0, 0)),
            pl.BlockSpec((1, d), lambda b: (0, 0)),
        ],
        out_specs=(pl.BlockSpec((bt, d), lambda b: (b, 0)),
                   pl.BlockSpec((bt, d), lambda b: (b, 0)),
                   pl.BlockSpec((bt, cp), lambda b: (b, 0))),
        compiler_params=pltpu.CompilerParams(
            dimension_semantics=("parallel",),      # batch axis -> megacore
            vmem_limit_bytes=32 * 1024 * 1024),
    )(x_flat, pooled, folded["w_big"], folded["bg"], folded["w_comb"],
      folded["b_comb"], folded["text_w"], folded["text_b"])


# ----------------------------------------------------------------------------
# Parameter construction + inference-time folding (derived from originals)
# ----------------------------------------------------------------------------
def make_params(key, *, num_nodes, graph_input_dim, embedding_dim,
                text_dim, vocab_size, num_classes):
    ks = jax.random.split(key, 12)
    scale = 0.02

    # symmetric, row-normalized adjacency with self loops (deterministic)
    a_raw = (jax.random.uniform(ks[0], (num_nodes, num_nodes)) > 0.7).astype(jnp.float32)
    a_sym = jnp.clip(a_raw + a_raw.T + jnp.eye(num_nodes, dtype=jnp.float32), 0.0, 1.0)
    adj = a_sym / jnp.sum(a_sym, axis=1, keepdims=True)

    params = dict(
        adj=adj,
        gcn_w=scale * jax.random.normal(ks[1], (graph_input_dim, embedding_dim), jnp.float32),
        gcn_b=jnp.zeros((1, embedding_dim), jnp.float32),
        pool64=scale * jax.random.normal(ks[2], (64, num_nodes), jnp.float32),
        pool256a=scale * jax.random.normal(ks[3], (256, num_nodes), jnp.float32),
        pool256b=scale * jax.random.normal(ks[4], (256, num_nodes), jnp.float32),
        graph_proj_w=scale * jax.random.normal(
            ks[5], ((64 + 256 + 256) * embedding_dim, text_dim), jnp.float32),
        graph_proj_b=jnp.zeros((1, text_dim), jnp.float32),
        tok_emb=scale * jax.random.normal(ks[6], (vocab_size, text_dim), jnp.float32),
        text_proj_w=scale * jax.random.normal(ks[7], (text_dim, text_dim), jnp.float32),
        text_proj_b=jnp.zeros((1, text_dim), jnp.float32),
        cls_w=scale * jax.random.normal(ks[8], (text_dim, num_classes), jnp.float32),
        cls_b=jnp.zeros((1, num_classes), jnp.float32),
    )
    return params, ks[9], ks[10]


def fold_inference_params(params, num_classes, lane=128):
    """Derive kernel-ready weights from the ORIGINAL parameterization.

    All folds are exact linear-algebra identities done in f32; each folded
    weight is cast to bf16 exactly once.
    """
    adj = params["adj"]                      # (N, N)
    wg = params["gcn_w"]                     # (F, E)
    n = adj.shape[0]
    f, e = wg.shape
    d = params["graph_proj_w"].shape[1]

    # (1) GCN fold: h_flat[b, n*E+e] = sum_{m,f} X[b,m,f] * A[n,m] * Wg[f,e]
    #     -> W_big[m*F+f, n*E+e] = A[n,m] * Wg[f,e]
    w_big = jnp.einsum("nm,fe->mfne", adj, wg).reshape(n * f, n * e)
    bg_tiled = jnp.tile(params["gcn_b"], (1, n))                 # (1, N*E)

    # (2) pooling + graph_projection fold:
    #     Wc[n*E+e, d] = sum_s P[s,n] * Wproj[s*E+e, d]
    p_cat = jnp.concatenate(
        [params["pool64"], params["pool256a"], params["pool256b"]], axis=0)   # (576, N)
    w3 = params["graph_proj_w"].reshape(p_cat.shape[0], e, d)                 # (576, E, D)
    wc = jnp.einsum("sn,sed->ned", p_cat, w3).reshape(n * e, d)               # (N*E, D)
    pb = params["graph_proj_b"]                                               # (1, D)

    # (3) classifier fold (graph_projection -> classifier is purely linear),
    #     lane-padded so the logits store is lane-dense.
    cp = max(lane, ((num_classes + lane - 1) // lane) * lane)
    wcls = jnp.zeros((d, cp), jnp.float32).at[:, :num_classes].set(params["cls_w"])
    cb = jnp.zeros((1, cp), jnp.float32).at[:, :num_classes].set(params["cls_b"])
    w_logit = wc @ wcls                                                       # (N*E, CP)
    b_logit = pb @ wcls + cb                                                  # (1, CP)
    w_comb = jnp.concatenate([wc, w_logit], axis=1)                           # (N*E, D+CP)
    b_comb = jnp.concatenate([pb, b_logit], axis=1)                           # (1, D+CP)

    return dict(
        w_big=w_big.astype(jnp.bfloat16),
        bg=bg_tiled,                                  # f32
        w_comb=w_comb.astype(jnp.bfloat16),
        b_comb=b_comb,                                # f32
        tok_emb=params["tok_emb"],                    # f32 lookup table
        text_w=params["text_proj_w"].astype(jnp.bfloat16),
        text_b=params["text_proj_b"],                 # f32
    )


# ----------------------------------------------------------------------------
# TabGLMModel forward (supervised, not text_only)
# ----------------------------------------------------------------------------
def tabglm_forward(folded, num_classes, text_in, graph_in):
    B, N, F = graph_in.shape

    # Text branch glue.
    # TODO(synk): real TextNetwork is a pretrained transformer LM; approximated
    # by a token-embedding lookup + mean pooling with the same output dim.
    tok = jnp.take(folded["tok_emb"], text_in, axis=0)          # (B, S, D) f32
    pooled = tok.mean(axis=1).astype(jnp.bfloat16)              # (B, D) bf16

    # Graph branch input: flatten node axis into features (row-major, free).
    x_flat = graph_in.reshape(B, N * F).astype(jnp.bfloat16)    # (B, N*F) bf16

    bt, bp = _batch_tiling(B)
    if bp != B:
        pad = bp - B
        x_flat = jnp.pad(x_flat, ((0, pad), (0, 0)))
        pooled = jnp.pad(pooled, ((0, pad), (0, 0)))

    gemb, temb, logits_pad = _fused_forward_call(x_flat, pooled, folded, bt)

    # forward() defines self.activation but never applies it -> raw logits.
    return gemb[:B], temb[:B], logits_pad[:B, :num_classes]


# ----------------------------------------------------------------------------
# Pure-JAX f32 reference (original, unfolded math) for a sanity check
# ----------------------------------------------------------------------------
def tabglm_reference(params, text_in, graph_in):
    B, N, F = graph_in.shape
    E = params["gcn_w"].shape[1]
    h = jax.nn.relu(
        jnp.einsum("nm,bmf,fe->bne", params["adj"], graph_in, params["gcn_w"])
        + params["gcn_b"])
    p_cat = jnp.concatenate(
        [params["pool64"], params["pool256a"], params["pool256b"]], axis=0)
    pooled = jnp.einsum("sn,bne->bse", p_cat, h).reshape(B, p_cat.shape[0] * E)
    gemb = pooled @ params["graph_proj_w"] + params["graph_proj_b"]
    tok = jnp.take(params["tok_emb"], text_in, axis=0)
    temb = tok.mean(axis=1) @ params["text_proj_w"] + params["text_proj_b"]
    logits = gemb @ params["cls_w"] + params["cls_b"]
    return gemb, temb, logits


if __name__ == "__main__":
    # small, module-consistent shapes
    B = 2                 # batch
    N = 16                # graph nodes per sample
    F = 12                # graph_input_dim
    E = 8                 # embedding_dim (graph) -> N*E = 128 (lane-dense)
    D_TEXT = 128          # text_encoder_output_dim
    S = 8                 # text sequence length
    VOCAB = 100
    NUM_CLASSES = 2

    key = jax.random.PRNGKey(0)
    params, k_graph, k_text = make_params(
        key, num_nodes=N, graph_input_dim=F, embedding_dim=E,
        text_dim=D_TEXT, vocab_size=VOCAB, num_classes=NUM_CLASSES)
    folded = fold_inference_params(params, num_classes=NUM_CLASSES)

    graph_in = jax.random.normal(k_graph, (B, N, F), jnp.float32)
    text_in = jax.random.randint(k_text, (B, S), 0, VOCAB, jnp.int32)

    fwd = jax.jit(functools.partial(tabglm_forward, folded, NUM_CLASSES))
    graph_embeddings, text_embeddings, logits = fwd(text_in, graph_in)
    jax.block_until_ready((graph_embeddings, text_embeddings, logits))

    assert graph_embeddings.shape == (B, D_TEXT)
    assert text_embeddings.shape == (B, D_TEXT)
    assert logits.shape == (B, NUM_CLASSES)
    assert jnp.all(jnp.isfinite(graph_embeddings))
    assert jnp.all(jnp.isfinite(text_embeddings))
    assert jnp.all(jnp.isfinite(logits))

    # numerical sanity check vs. the unfolded f32 reference (bf16 tolerance)
    g_ref, t_ref, l_ref = tabglm_reference(params, text_in, graph_in)
    assert jnp.allclose(graph_embeddings, g_ref, rtol=5e-2, atol=2e-3)
    assert jnp.allclose(text_embeddings, t_ref, rtol=5e-2, atol=2e-3)
    assert jnp.allclose(logits, l_ref, rtol=5e-2, atol=2e-3)

    print("KERNEL_OK")
</pallas_src>

<mosaic_0001>
module attributes {stable_mosaic.version = 11 : i64} {
  func.func @_fused_kernel(%arg0: i32, %arg1: memref<2x192xbf16, #tpu.memory_space<vmem>>, %arg2: memref<2x128xbf16, #tpu.memory_space<vmem>>, %arg3: memref<192x128xbf16, #tpu.memory_space<vmem>>, %arg4: memref<1x128xf32, #tpu.memory_space<vmem>>, %arg5: memref<128x256xbf16, #tpu.memory_space<vmem>>, %arg6: memref<1x256xf32, #tpu.memory_space<vmem>>, %arg7: memref<128x128xbf16, #tpu.memory_space<vmem>>, %arg8: memref<1x128xf32, #tpu.memory_space<vmem>>, %arg9: memref<2x128xf32, #tpu.memory_space<vmem>>, %arg10: memref<2x128xf32, #tpu.memory_space<vmem>>, %arg11: memref<2x128xf32, #tpu.memory_space<vmem>>) attributes {dimension_semantics = [#tpu.dimension_semantics<parallel>], iteration_bounds = array<i64: 1>, scalar_prefetch = 0 : i64, scratch_operands = 0 : i64, tpu.core_type = #tpu.core_type<tc>, window_params = [{transform_indices = @transform_0, window_bounds = array<i64: 2, 192>}, {transform_indices = @transform_1, window_bounds = array<i64: 2, 128>}, {pipeline_mode = #tpu.pipeline_mode<synchronous>, transform_indices = @transform_2, window_bounds = array<i64: 192, 128>}, {pipeline_mode = #tpu.pipeline_mode<synchronous>, transform_indices = @transform_3, window_bounds = array<i64: 1, 128>}, {pipeline_mode = #tpu.pipeline_mode<synchronous>, transform_indices = @transform_4, window_bounds = array<i64: 128, 256>}, {pipeline_mode = #tpu.pipeline_mode<synchronous>, transform_indices = @transform_5, window_bounds = array<i64: 1, 256>}, {pipeline_mode = #tpu.pipeline_mode<synchronous>, transform_indices = @transform_6, window_bounds = array<i64: 128, 128>}, {pipeline_mode = #tpu.pipeline_mode<synchronous>, transform_indices = @transform_7, window_bounds = array<i64: 1, 128>}, {transform_indices = @transform_8, window_bounds = array<i64: 2, 128>}, {transform_indices = @transform_9, window_bounds = array<i64: 2, 128>}, {transform_indices = @transform_10, window_bounds = array<i64: 2, 128>}]} {
    %c0 = arith.constant 0 : index
    %c0_0 = arith.constant 0 : index
    %0 = vector.load %arg1[%c0, %c0_0] : memref<2x192xbf16, #tpu.memory_space<vmem>>, vector<2x192xbf16>
    %c0_1 = arith.constant 0 : index
    %c0_2 = arith.constant 0 : index
    %1 = vector.load %arg3[%c0_1, %c0_2] : memref<192x128xbf16, #tpu.memory_space<vmem>>, vector<192x128xbf16>
    %cst = arith.constant dense<0.000000e+00> : vector<2x128xf32>
    %2 = tpu.matmul %0, %1, %cst {dimension_numbers = #tpu.dot_dimension_numbers<[1], [0], [0], [1], [0, 0, 1, 1], [], []>} : vector<2x192xbf16>, vector<192x128xbf16>, vector<2x128xf32> -> vector<2x128xf32>
    %c0_3 = arith.constant 0 : index
    %c0_4 = arith.constant 0 : index
    %3 = vector.load %arg4[%c0_3, %c0_4] : memref<1x128xf32, #tpu.memory_space<vmem>>, vector<1x128xf32>
    %4 = vector.broadcast %3 : vector<1x128xf32> to vector<2x128xf32>
    %5 = arith.addf %2, %4 : vector<2x128xf32>
    %cst_5 = arith.constant 0.000000e+00 : f32
    %6 = vector.broadcast %cst_5 : f32 to vector<2x128xf32>
    %7 = arith.maximumf %5, %6 : vector<2x128xf32>
    %8 = arith.truncf %7 : vector<2x128xf32> to vector<2x128xbf16>
    %c0_6 = arith.constant 0 : index
    %c0_7 = arith.constant 0 : index
    %9 = vector.load %arg5[%c0_6, %c0_7] : memref<128x256xbf16, #tpu.memory_space<vmem>>, vector<128x256xbf16>
    %cst_8 = arith.constant dense<0.000000e+00> : vector<2x256xf32>
    %10 = tpu.matmul %8, %9, %cst_8 {dimension_numbers = #tpu.dot_dimension_numbers<[1], [0], [0], [1], [0, 0, 1, 1], [], []>} : vector<2x128xbf16>, vector<128x256xbf16>, vector<2x256xf32> -> vector<2x256xf32>
    %c0_9 = arith.constant 0 : index
    %c0_10 = arith.constant 0 : index
    %11 = vector.load %arg6[%c0_9, %c0_10] : memref<1x256xf32, #tpu.memory_space<vmem>>, vector<1x256xf32>
    %12 = vector.broadcast %11 : vector<1x256xf32> to vector<2x256xf32>
    %13 = arith.addf %10, %12 : vector<2x256xf32>
    %14 = vector.extract_strided_slice %13 {offsets = [0, 0], sizes = [2, 128], strides = [1, 1]} : vector<2x256xf32> to vector<2x128xf32>
    %c0_11 = arith.constant 0 : index
    %c0_12 = arith.constant 0 : index
    %15 = vector.load %arg9[%c0_11, %c0_12] : memref<2x128xf32, #tpu.memory_space<vmem>>, vector<2x128xf32>
    tpu.vector_store %arg9[%c0_11, %c0_12], %14 {strides = array<i32>} : memref<2x128xf32, #tpu.memory_space<vmem>>, vector<2x128xf32>,
    %16 = vector.extract_strided_slice %13 {offsets = [0, 128], sizes = [2, 128], strides = [1, 1]} : vector<2x256xf32> to vector<2x128xf32>
    %c0_13 = arith.constant 0 : index
    %c0_14 = arith.constant 0 : index
    %17 = vector.load %arg11[%c0_13, %c0_14] : memref<2x128xf32, #tpu.memory_space<vmem>>, vector<2x128xf32>
    tpu.vector_store %arg11[%c0_13, %c0_14], %16 {strides = array<i32>} : memref<2x128xf32, #tpu.memory_space<vmem>>, vector<2x128xf32>,
    %c0_15 = arith.constant 0 : index
    %c0_16 = arith.constant 0 : index
    %18 = vector.load %arg2[%c0_15, %c0_16] : memref<2x128xbf16, #tpu.memory_space<vmem>>, vector<2x128xbf16>
    %c0_17 = arith.constant 0 : index
    %c0_18 = arith.constant 0 : index
    %19 = vector.load %arg7[%c0_17, %c0_18] : memref<128x128xbf16, #tpu.memory_space<vmem>>, vector<128x128xbf16>
    %cst_19 = arith.constant dense<0.000000e+00> : vector<2x128xf32>
    %20 = tpu.matmul %18, %19, %cst_19 {dimension_numbers = #tpu.dot_dimension_numbers<[1], [0], [0], [1], [0, 0, 1, 1], [], []>} : vector<2x128xbf16>, vector<128x128xbf16>, vector<2x128xf32> -> vector<2x128xf32>
    %c0_20 = arith.constant 0 : index
    %c0_21 = arith.constant 0 : index
    %21 = vector.load %arg8[%c0_20, %c0_21] : memref<1x128xf32, #tpu.memory_space<vmem>>, vector<1x128xf32>
    %22 = vector.broadcast %21 : vector<1x128xf32> to vector<2x128xf32>
    %23 = arith.addf %20, %22 : vector<2x128xf32>
    %c0_22 = arith.constant 0 : index
    %c0_23 = arith.constant 0 : index
    %24 = vector.load %arg10[%c0_22, %c0_23] : memref<2x128xf32, #tpu.memory_space<vmem>>, vector<2x128xf32>
    tpu.vector_store %arg10[%c0_22, %c0_23], %23 {strides = array<i32>} : memref<2x128xf32, #tpu.memory_space<vmem>>, vector<2x128xf32>,
    return
  }
  func.func @transform_0(%arg0: i32) -> (i32, i32) {
    %c0_i32 = arith.constant 0 : i32
    %c0_i32_0 = arith.constant 0 : i32
    return %arg0, %c0_i32 : i32, i32
  }
  func.func @transform_1(%arg0: i32) -> (i32, i32) {
    %c0_i32 = arith.constant 0 : i32
    %c0_i32_0 = arith.constant 0 : i32
    return %arg0, %c0_i32 : i32, i32
  }
  func.func @transform_2(%arg0: i32) -> (i32, i32) {
    %c0_i32 = arith.constant 0 : i32
    %c0_i32_0 = arith.constant 0 : i32
    %c0_i32_1 = arith.constant 0 : i32
    return %c0_i32, %c0_i32_0 : i32, i32
  }
  func.func @transform_3(%arg0: i32) -> (i32, i32) {
    %c0_i32 = arith.constant 0 : i32
    %c0_i32_0 = arith.constant 0 : i32
    %c0_i32_1 = arith.constant 0 : i32
    return %c0_i32, %c0_i32_0 : i32, i32
  }
  func.func @transform_4(%arg0: i32) -> (i32, i32) {
    %c0_i32 = arith.constant 0 : i32
    %c0_i32_0 = arith.constant 0 : i32
    %c0_i32_1 = arith.constant 0 : i32
    return %c0_i32, %c0_i32_0 : i32, i32
  }
  func.func @transform_5(%arg0: i32) -> (i32, i32) {
    %c0_i32 = arith.constant 0 : i32
    %c0_i32_0 = arith.constant 0 : i32
    %c0_i32_1 = arith.constant 0 : i32
    return %c0_i32, %c0_i32_0 : i32, i32
  }
  func.func @transform_6(%arg0: i32) -> (i32, i32) {
    %c0_i32 = arith.constant 0 : i32
    %c0_i32_0 = arith.constant 0 : i32
    %c0_i32_1 = arith.constant 0 : i32
    return %c0_i32, %c0_i32_0 : i32, i32
  }
  func.func @transform_7(%arg0: i32) -> (i32, i32) {
    %c0_i32 = arith.constant 0 : i32
    %c0_i32_0 = arith.constant 0 : i32
    %c0_i32_1 = arith.constant 0 : i32
    return %c0_i32, %c0_i32_0 : i32, i32
  }
  func.func @transform_8(%arg0: i32) -> (i32, i32) {
    %c0_i32 = arith.constant 0 : i32
    %c0_i32_0 = arith.constant 0 : i32
    return %arg0, %c0_i32 : i32, i32
  }
  func.func @transform_9(%arg0: i32) -> (i32, i32) {
    %c0_i32 = arith.constant 0 : i32
    %c0_i32_0 = arith.constant 0 : i32
    return %arg0, %c0_i32 : i32, i32
  }
  func.func @transform_10(%arg0: i32) -> (i32, i32) {
    %c0_i32 = arith.constant 0 : i32
    %c0_i32_0 = arith.constant 0 : i32
    return %arg0, %c0_i32 : i32, i32
  }
}

</mosaic_0001>

<bundles_post_ra>
// kernel: tabglm_forward.1
= control target key start
LH: loop header
LB: loop body
LE: loop exit
PB: predicated region body
PF: predicated region fallthrough
CT: control target
= control target key end

     0   :  { %16 = vsyncpa [#allocation3], 0  ;;  %v704_v1 = vmov 0   ;;  %v79_v4 = vlaneseq  ;;  %v705_v8 = vmov 1966171168   ;;  %vm163_vm0 = vcmask 523264   ;;  %s948_s0 = inlined_call_operand.vmem [shape: bf16[2,192], index: 0, kind: input, shape index: {}]   ;;  %s949_s1 = inlined_call_operand.vmem [shape: bf16[2,128], index: 1, kind: input, shape index: {}]   ;;  %s950_s2 = inlined_call_operand.vmem [shape: bf16[192,128], index: 2, kind: input, shape index: {}]   ;;  %s951_s3 = inlined_call_operand.vmem [shape: f32[1,128], index: 3, kind: input, shape index: {}, may-alias: {3,7}]   ;;  %s952_s4 = inlined_call_operand.vmem [shape: bf16[128,256], index: 4, kind: input, shape index: {}]   ;;  %s953_s5 = inlined_call_operand.vmem [shape: f32[1,256], index: 5, kind: input, shape index: {}]   ;;  %s954_s6 = inlined_call_operand.vmem [shape: bf16[128,128], index: 6, kind: input, shape index: {}]   ;;  %s955_s7 = inlined_call_operand.vmem [shape: f32[1,128], index: 7, kind: input, shape index: {}, may-alias: {3,7}]   ;;  %s956_s8 = inlined_call_operand.hbm [shape: f32[2,128], index: 8, kind: output, shape index: {0}]   ;;  %s957_s9 = inlined_call_operand.hbm [shape: f32[2,128], index: 9, kind: output, shape index: {1}]   ;;  %s958_s10 = inlined_call_operand.hbm [shape: f32[2,128], index: 10, kind: output, shape index: {2}]  }
   0x1   :  { %v590_v0 = vld [vmem:[%s950_s2] sm:$0xff]   ;;  %167 = vmatprep.subr.bf16.mxu0 %v704_v1  ;;  %349 = vmatprep.mubr.bf16.mxu1 %v704_v1  ;;  %v591_v2 = vld [vmem:[%s950_s2 + $0x8] sm:$0xff]   ;;  %v592_v3 = vld [vmem:[%s950_s2 + $0x10] sm:$0xff]   ;;  %v77_v9 = vunpack.c.l.s4 %v705_v8 }
   0x2   :  { %168 = vmatpush1.bf16.msra.mxu0 %v590_v0  ;;  %v593_v5 = vld [vmem:[%s950_s2 + $0x18] sm:$0xff]   ;;  %v594_v6 = vld [vmem:[%s950_s2 + $0x20] sm:$0xff]   ;;  %v791_v10 = vshrl.u32 %v79_v4, 7  ;;  %v595_v19 = vld [vmem:[%s950_s2 + $0x28] sm:$0xff]  }
   0x3   :  { %169 = vmatprep.subr.bf16.mxu0 %v704_v1  ;;  %v789_v7 = vld.sshfl [vmem:[%s948_s0] sm:$0x11 pattern:$0x75316420]  ;;  %v602_v11 = vld [vmem:[%s952_s4 + $0x4] ss:$8 sps:$4 sm:$0xff]   ;;  %v78_v14 = vunpack.c.0.s8 %v77_v9 }
   0x4   :  { %v604_v12 = vld [vmem:[%s952_s4] ss:$8 sps:$4 sm:$0xff]   ;;  %v75_v13 = vcombine.high %v789_v7, %v789_v7  ;;  %317 = vmatprep.subr.bf16.mxu1 %v602_v11  ;;  %v605_v15 = vld [vmem:[%s952_s4 + $0x14] ss:$8 sps:$4 sm:$0xff]   ;;  %v607_v16 = vld [vmem:[%s952_s4 + $0x10] ss:$8 sps:$4 sm:$0xff]  }
   0x5   :  { %318 = vmatpush1.bf16.msra.mxu1 %v604_v12  ;;  %v81_v17 = vsub.s32 %v78_v14, %v791_v10  ;;  %v608_v18 = vld [vmem:[%s952_s4 + $0x24] ss:$8 sps:$4 sm:$0xff]   ;;  %v610_v21 = vld [vmem:[%s952_s4 + $0x20] ss:$8 sps:$4 sm:$0xff]   ;;  %v611_v22 = vld [vmem:[%s952_s4 + $0x34] ss:$8 sps:$4 sm:$0xff]  }
   0x6   :  { %170 = vmatpush1.bf16.msra.mxu0 %v591_v2  ;;  %319 = vmatprep.subr.bf16.mxu1 %v605_v15  ;;  %v596_v23 = vld [vmem:[%s950_s2 + $0x30] sm:$0xff]   ;;  %v614_v25 = vld [vmem:[%s952_s4 + $0x44] ss:$8 sps:$4 sm:$0xff]   ;;  %v597_v26 = vld [vmem:[%s950_s2 + $0x38] sm:$0xff]  }
   0x7   :  { %171 = vmatprep.subr.bf16.mxu0 %v704_v1  ;;  %v89_v20 = vrot.slane %v75_v13, %v81_v17  ;;  %v613_v24 = vld [vmem:[%s952_s4 + $0x30] ss:$8 sps:$4 sm:$0xff]   ;;  %v616_v27 = vld [vmem:[%s952_s4 + $0x40] ss:$8 sps:$4 sm:$0xff]  }
   0x9   :  { %320 = vmatpush1.bf16.msra.mxu1 %v607_v16  ;;  %528 = vmatprep.mubr.msk.bf16.mxu0 %vm163_vm0, %v89_v20 }
   0xa   :  { %172 = vmatpush1.bf16.msra.mxu0 %v592_v3  ;;  %321 = vmatprep.subr.bf16.mxu1 %v608_v18 }
   0xb   :  { %173 = vmatprep.subr.bf16.mxu0 %v704_v1 }
   0xd   :  { %322 = vmatpush1.bf16.msra.mxu1 %v610_v21 }
   0xe   :  { %174 = vmatpush1.bf16.msra.mxu0 %v593_v5  ;;  %323 = vmatprep.subr.bf16.mxu1 %v611_v22 }
   0xf   :  { %175 = vmatprep.subr.bf16.mxu0 %v704_v1 }
  0x11   :  { %324 = vmatpush1.bf16.msra.mxu1 %v613_v24 }
  0x12   :  { %176 = vmatpush1.bf16.msra.mxu0 %v594_v6 }
  0x13   :  { %177 = vmatprep.subr.bf16.mxu0 %v704_v1 }
  0x16   :  { %178 = vmatpush1.bf16.msra.mxu0 %v595_v19 }
  0x17   :  { %179 = vmatprep.subr.bf16.mxu0 %v704_v1 }
  0x1a   :  { %180 = vmatpush1.bf16.msra.mxu0 %v596_v23 }
  0x1b   :  { %181 = vmatprep.subr.bf16.mxu0 %v704_v1 }
  0x1c   :  { %17 = vsyncpa [#allocation5], 0  ;;  %325 = vmatprep.subr.bf16.mxu1 %v614_v25  ;;  %v617_v28 = vld [vmem:[%s952_s4 + $0x54] ss:$8 sps:$4 sm:$0xff]   ;;  %v598_v29 = vld [vmem:[%s950_s2 + $0x40] sm:$0xff]   ;;  %v82_v36 = vrot.slane %v789_v7, %v81_v17  ;;  %v706_v39 = vmov 0.0  }
  0x1d   :  { %326 = vmatpush1.bf16.msra.mxu1 %v616_v27  ;;  %v619_v30 = vld [vmem:[%s952_s4 + $0x50] ss:$8 sps:$4 sm:$0xff]   ;;  %v620_v31 = vld [vmem:[%s952_s4 + $0x64] ss:$8 sps:$4 sm:$0xff]   ;;  %v622_v33 = vld [vmem:[%s952_s4 + $0x60] ss:$8 sps:$4 sm:$0xff]  }
  0x1e   :  { %182 = vmatpush1.bf16.msra.mxu0 %v597_v26  ;;  %327 = vmatprep.subr.bf16.mxu1 %v617_v28  ;;  %v599_v32 = vld [vmem:[%s950_s2 + $0x48] sm:$0xff]   ;;  %v600_v34 = vld [vmem:[%s950_s2 + $0x50] sm:$0xff]   ;;  %v601_v35 = vld [vmem:[%s950_s2 + $0x58] sm:$0xff]   ;;  %vm707_vm1 = vmmov 0   ;;  %v229_v57 = vsub.s32 0, %v791_v10  ;;  %v233_v59 = vsub.s32 1, %v791_v10 }
  0x1f   :  { %183 = vmatprep.subr.bf16.mxu0 %v704_v1  ;;  %v623_v37 = vld [vmem:[%s952_s4 + $0x74] ss:$8 sps:$4 sm:$0xff]   ;;  %v625_v38 = vld [vmem:[%s952_s4 + $0x70] ss:$8 sps:$4 sm:$0xff]   ;;  %v514_v40 = vld [vmem:[%s951_s3] ss:$0 sm:$0xff] }
  0x20   :  { %v626_v47 = vld [vmem:[%s954_s6] sm:$0xff]   ;;  %v627_v49 = vld [vmem:[%s954_s6 + $0x8] sm:$0xff]   ;;  %v628_v50 = vld [vmem:[%s954_s6 + $0x10] sm:$0xff]   ;;  %s708_s27 = smov [#allocation2]  }
  0x21   :  { %328 = vmatpush1.bf16.msra.mxu1 %v619_v30  ;;  %v629_v51 = vld [vmem:[%s954_s6 + $0x18] sm:$0xff]   ;;  %v630_v52 = vld [vmem:[%s954_s6 + $0x20] sm:$0xff]   ;;  %v631_v53 = vld [vmem:[%s954_s6 + $0x28] sm:$0xff]   ;;  %s479_s28 = sshll.u32 %s708_s27, 4  ;;  %s480_s28 = int_to_ptr.vmem [resolvable:$true] %s479_s28 }
  0x22   :  { %184 = vmatpush1.bf16.msra.mxu0 %v598_v29  ;;  %329 = vmatprep.subr.bf16.mxu1 %v620_v31  ;;  %v632_v54 = vld [vmem:[%s954_s6 + $0x30] sm:$0xff]   ;;  %v633_v55 = vld [vmem:[%s954_s6 + $0x38] sm:$0xff]   ;;  %v360_v56 = vld [vmem:[%s949_s1] sm:$0x1]  ;;  %s634_s1 = scalar_lea.vmem %s480_s28, 32  ;;  %p639_p1 = scmp.lt.s32.totalorder %s480_s28, %s480_s28 }
  0x23   :  { %185 = vmatprep.subr.bf16.mxu0 %v704_v1  ;;  %v225_v58 = vld [vmem:[%s953_s5] sm:$0x3]  ;;  %p635_p0 = scmp.ne.s32.totalorder %s480_s28, %s634_s1  ;;  %p640_p2 = scmp.lt.s32.totalorder %s634_s1, %s634_s1 }
  0x24   :  { %v230_v60 = vrot.slane %v225_v58, %v229_v57  ;;  %v234_v61 = vrot.slane %v225_v58, %v233_v59 }
  0x25   :  { %330 = vmatpush1.bf16.msra.mxu1 %v622_v33  ;;  %p641_p3 = por %p640_p2, %p639_p1 }
  0x26   :  { %186 = vmatpush1.bf16.msra.mxu0 %v599_v32  ;;  %331 = vmatprep.subr.bf16.mxu1 %v623_v37 }
  0x27   :  { %187 = vmatprep.subr.bf16.mxu0 %v704_v1  ;;  %p642_p4 = pnand %p641_p3, %p635_p0 }
  0x29   :  { %332 = vmatpush1.bf16.msra.mxu1 %v625_v38 }
  0x2a   :  { %188 = vmatpush1.bf16.msra.mxu0 %v600_v34  ;;  %563 = vmatprep.subr.bf16.mxu1 %v706_v39 }
  0x2b   :  { %189 = vmatprep.subr.bf16.mxu0 %v704_v1 }
  0x2e   :  { %190 = vmatpush1.bf16.msra.mxu0 %v601_v35 }
  0x31   :  { %200 = vmatmul.mubr.bf16.vlgmr.msra.gmra.mrb[0].mxu0 %v82_v36 }
 0x104   :  { %v201_v41 = vpop.f32.mrb[0].mxu0 }
 0x105   :  { %v202_v42 = vadd.f32 %v514_v40, %v201_v41  ;;  %v203_v43 = vpop.f32.mrb[1].mxu0 }
 0x106   :  { %v204_v44 = vpop.f32.mrb[2].mxu0 }
 0x107   :  { %v207_v45 = vmax.f32 %v202_v42, 0.0  ;;  %v205_v46 = vpop.f32.mrb[3].mxu0 }
 0x109   :  { %v208_v48 = vpack.c.bf16 %v207_v45, %v207_v45 }
 0x10b   :  { %350 = vmatmul.mubr.bf16.vlgmr.msra.gmra.mrb[0].mxu1 %v208_v48 }
 0x10c   :  { %564 = vmatpush3.bf16.msra.mxu1 %v626_v47  ;;  %579 = vmatprep.mubr.msk.bf16.mxu1 %vm707_vm1, %v706_v39 }
 0x10d   :  { %565 = vmatprep.subr.bf16.mxu1 %v706_v39 }
 0x110   :  { %566 = vmatpush3.bf16.msra.mxu1 %v627_v49 }
 0x111   :  { %567 = vmatprep.subr.bf16.mxu1 %v706_v39 }
 0x114   :  { %568 = vmatpush3.bf16.msra.mxu1 %v628_v50 }
 0x115   :  { %569 = vmatprep.subr.bf16.mxu1 %v706_v39 }
 0x118   :  { %570 = vmatpush3.bf16.msra.mxu1 %v629_v51 }
 0x119   :  { %571 = vmatprep.subr.bf16.mxu1 %v706_v39 }
 0x11c   :  { %572 = vmatpush3.bf16.msra.mxu1 %v630_v52 }
 0x11d   :  { %573 = vmatprep.subr.bf16.mxu1 %v706_v39 }
 0x120   :  { %574 = vmatpush3.bf16.msra.mxu1 %v631_v53 }
 0x121   :  { %575 = vmatprep.subr.bf16.mxu1 %v706_v39 }
 0x124   :  { %576 = vmatpush3.bf16.msra.mxu1 %v632_v54 }
 0x125   :  { %577 = vmatprep.subr.bf16.mxu1 %v706_v39 }
 0x128   :  { %578 = vmatpush3.bf16.msra.mxu1 %v633_v55 }
 0x12b   :  { %580 = vmatmul.mubr.bf16.vlgmr.msra.gmra.mrb[4].mxu1 %v360_v56 }
 0x1de   :  { %v351_v62 = vpop.f32.mrb[0].mxu1 }
 0x1df   :  { %v352_v63 = vadd.f32 %v351_v62, %v230_v60  ;;  %v353_v0 = vpop.f32.mrb[1].mxu1 }
 0x1e0   :  { %v354_v1 = vadd.f32 %v353_v0, %v234_v61  ;;  %v355_v2 = vpop.f32.mrb[2].mxu1 }
 0x1e1   :  { %358 = vst [vmem:[#allocation2] sm:$0x3] %v352_v63  ;;  %v356_v3 = vpop.f32.mrb[3].mxu1 }
 0x1e2   :  { %359 = vst [vmem:[#allocation6] sm:$0x3] %v354_v1 }
 0x1e3   :  { %645 = shalt.err (!%p642_p4)
}
 0x1e4   :  { %s646_s0 = scalar_lea.hbm %s956_s8, 32 }
 0x1e5   :  { %p647_p5 = scmp.ne.s32.totalorder %s956_s8, %s646_s0  ;;  %p650_p6 = scmp.lt.u32.totalorder %s646_s0, %s956_s8 }
 0x1e7   :  { %p652_p7 = pnand %p650_p6, %p647_p5 }
 0x1e9   :  { %655 = shalt.err (!%p652_p7)
}
 0x1ea   :  { %482 = dma.vmem_to_hbm [thread:$0]  %s480_s28, 32, %s956_s8, [#allocation3]   ;;  %v545_v4 = vld [vmem:[%s955_s7] ss:$0 sm:$0xff] }
 0x1eb   :  { %s709_s14 = smov [#allocation4]   ;;  %s710_s16 = smov [#allocation6]  }
 0x1ec   :  { %s489_s15 = sshll.u32 %s709_s14, 4  ;;  %s499_s17 = sshll.u32 %s710_s16, 4  ;;  %s490_s15 = int_to_ptr.vmem [resolvable:$true] %s489_s15  ;;  %s500_s17 = int_to_ptr.vmem [resolvable:$true] %s499_s17 }
 0x1ed   :  { %s656_s18 = scalar_lea.vmem %s490_s15, 32  ;;  %p661_p9 = scmp.lt.s32.totalorder %s490_s15, %s490_s15 }
 0x1ee   :  { %p657_p8 = scmp.ne.s32.totalorder %s490_s15, %s656_s18  ;;  %p662_p10 = scmp.lt.s32.totalorder %s656_s18, %s656_s18 }
 0x1f0   :  { %p663_p11 = por %p662_p10, %p661_p9 }
 0x1f2   :  { %p664_p12 = pnand %p663_p11, %p657_p8 }
 0x1fe   :  { %v466_v5 = vpop.f32.mrb[4].mxu1 }
 0x1ff   :  { %v467_v6 = vadd.f32 %v545_v4, %v466_v5  ;;  %v581_v7 = vpop.f32.mrb[5].mxu1 }
 0x200   :  { %v469_v8 = vpop.f32.mrb[6].mxu1 }
 0x201   :  { %472 = vst [vmem:[#allocation4] sm:$0x3] %v467_v6  ;;  %v582_v9 = vpop.f32.mrb[7].mxu1 }
 0x202   :  { %667 = shalt.err (!%p664_p12)
}
 0x203   :  { %s668_s19 = scalar_lea.hbm %s957_s9, 32 }
 0x204   :  { %p669_p13 = scmp.ne.s32.totalorder %s957_s9, %s668_s19  ;;  %p672_p0 = scmp.lt.u32.totalorder %s668_s19, %s957_s9 }
 0x206   :  { %p674_p1 = pnand %p672_p0, %p669_p13 }
 0x208   :  { %677 = shalt.err (!%p674_p1)
}
 0x209   :  { %492 = dma.vmem_to_hbm [thread:$0]  %s490_s15, 32, %s957_s9, [#allocation5]  }
 0x20a   :  { %s678_s26 = scalar_lea.vmem %s500_s17, 32  ;;  %p683_p3 = scmp.lt.s32.totalorder %s500_s17, %s500_s17 }
 0x20b   :  { %p679_p2 = scmp.ne.s32.totalorder %s500_s17, %s678_s26  ;;  %p684_p4 = scmp.lt.s32.totalorder %s678_s26, %s678_s26 }
 0x20d   :  { %p685_p5 = por %p684_p4, %p683_p3 }
 0x20f   :  { %p686_p6 = pnand %p685_p5, %p679_p2 }
 0x211   :  { %689 = shalt.err (!%p686_p6)
}
 0x212   :  { %s690_s1 = scalar_lea.hbm %s958_s10, 32 }
 0x213   :  { %p691_p7 = scmp.ne.s32.totalorder %s958_s10, %s690_s1  ;;  %p694_p8 = scmp.lt.u32.totalorder %s690_s1, %s958_s10 }
 0x215   :  { %p696_p9 = pnand %p694_p8, %p691_p7 }
 0x217   :  { %699 = shalt.err (!%p696_p9)
}
 0x218   :  { %502 = dma.vmem_to_hbm [thread:$0]  %s500_s17, 32, %s958_s10, [#allocation5]  }
 0x219   :  { %700 = dma.done.wait [#allocation3], 32  }
 0x21a   :  { %701 = vsyncadd [#allocation3], 4294967264 }
 0x21b   :  { %702 = dma.done.wait [#allocation5], 64  }
 0x21c   :  { %703 = vsyncadd [#allocation5], 4294967232 }
 0x21d   :  { %512 = vsyncpa [#allocation3], 1 }
 0x21e   :  { %513 = vsyncpa [#allocation5], 1 }

</bundles_post_ra>
